<compile_context>
chip_gen: v7x
topology: tpu7x:2x2x1
jax: 0.10.0
libtpu: 0.0.40
codegen_flags: <defaults>
</compile_context>

<pallas_src>
import functools

import jax
import jax.numpy as jnp
import numpy as np
from jax.experimental import pallas as pl
from jax.experimental.pallas import tpu as pltpu


# ----------------------------------------------------------------------------
# Fused kernel: attention (all heads) + glue + W_0 projection, one batch / step.
# ----------------------------------------------------------------------------
_NT_DIMS = (((1,), (1,)), ((), ()))  # contract last axes of both operands (A @ B^T)


def _fused_mhca_kernel(*refs, heads, scale, has_mask):
    if has_mask:
        q_ref, k_ref, v_ref, w0_ref, bias_ref, o_ref = refs
    else:
        q_ref, k_ref, v_ref, w0_ref, o_ref = refs
        bias_ref = None

    head_outs = []
    for h in range(heads):  # static unroll; one basic block for the LLO scheduler
        q = q_ref[0, h] * scale          # (Lq, D)  scale folded into q
        k = k_ref[0, h]                  # (Lk, D)
        v = v_ref[0, h]                  # (Lk, D)

        # scaled_dot_prod = einsum('b h i d, b h j d -> b h i j') * scale
        s = jax.lax.dot_general(q, k, _NT_DIMS, preferred_element_type=jnp.float32)
        if bias_ref is not None:
            s = s + bias_ref[...]        # 0.0 or -inf mask bias

        # numerically stable softmax, reciprocal-multiply (EUP) instead of divide
        m = jnp.max(s, axis=-1, keepdims=True)
        e = jnp.exp(s - m)
        l = jnp.sum(e, axis=-1, keepdims=True)
        p = e * pl.reciprocal(l, approx=True)

        # out = einsum('b h i j, b h j d -> b h i d')
        head_outs.append(
            jnp.dot(p.astype(v.dtype), v, preferred_element_type=jnp.float32)
        )

    # rearrange 'b h t d -> b t (h d)' — stays in vregs, never touches HBM.
    glue = jnp.concatenate(head_outs, axis=-1)          # (Lq, H*D)

    # W_0 projection: y = glue @ W0^T, with W0 in nn.Linear layout (dim, H*D).
    y = jax.lax.dot_general(
        glue.astype(w0_ref.dtype), w0_ref[...], _NT_DIMS,
        preferred_element_type=jnp.float32,
    )                                                    # (Lq, dim)
    o_ref[0] = y.astype(o_ref.dtype)


# ----------------------------------------------------------------------------
# Full forward, matching MultiHeadCrossAttention.forward(q, k, v, mask=None)
# ----------------------------------------------------------------------------
def multi_head_cross_attention(q, k, v, w0, mask=None):
    """
    q, k, v: [B, H, L, D] float32
    w0:      [dim, H*D]   (nn.Linear(H*D, dim, bias=False).weight, used as-is)
    mask:    optional bool [Lq, Lk]; True positions are filled with -inf.
    returns: [B, Lq, dim]
    """
    B, H, Lq, D = q.shape
    Lk = k.shape[2]
    dim, HD = w0.shape
    assert HD == H * D
    scale = float(D) ** (-0.5)
    has_mask = mask is not None

    kernel = functools.partial(
        _fused_mhca_kernel, heads=H, scale=scale, has_mask=has_mask
    )

    in_specs = [
        pl.BlockSpec((1, H, Lq, D), lambda b: (b, 0, 0, 0)),
        pl.BlockSpec((1, H, Lk, D), lambda b: (b, 0, 0, 0)),
        pl.BlockSpec((1, H, Lk, D), lambda b: (b, 0, 0, 0)),
        pl.BlockSpec((dim, HD), lambda b: (0, 0)),       # weight resident across grid
    ]
    args = [q, k, v, w0]
    if has_mask:
        assert mask.shape == (Lq, Lk)
        bias = jnp.where(mask, -jnp.inf, 0.0).astype(jnp.float32)
        in_specs.append(pl.BlockSpec((Lq, Lk), lambda b: (0, 0)))
        args.append(bias)

    return pl.pallas_call(
        kernel,
        out_shape=jax.ShapeDtypeStruct((B, Lq, dim), q.dtype),
        grid_spec=pltpu.PrefetchScalarGridSpec(
            num_scalar_prefetch=0,
            grid=(B,),                                   # 2 steps; parallel for v7x 2 TCs
            in_specs=in_specs,
            out_specs=pl.BlockSpec((1, Lq, dim), lambda b: (b, 0, 0)),
        ),
        compiler_params=pltpu.CompilerParams(
            dimension_semantics=("parallel",)
        ),
    )(*args)


# ----------------------------------------------------------------------------
# Pure-JAX reference for verification.
# ----------------------------------------------------------------------------
def reference(q, k, v, w0, mask=None):
    D = q.shape[-1]
    s = jnp.einsum("bhid,bhjd->bhij", q, k) * (D ** -0.5)
    if mask is not None:
        s = jnp.where(mask, -jnp.inf, s)
    p = jax.nn.softmax(s, axis=-1)
    o = jnp.einsum("bhij,bhjd->bhid", p, v)
    B, H, Lq, _ = o.shape
    o = jnp.transpose(o, (0, 2, 1, 3)).reshape(B, Lq, H * D)
    return jnp.einsum("btk,dk->btd", o, w0)


if __name__ == "__main__":
    # Module hyperparameters: dim=32, heads=4, dim_head=8  (so H*D == dim here)
    dim, heads, dim_head = 32, 4, 8
    B, Lq, Lk = 2, 8, 8

    key = jax.random.PRNGKey(0)
    kq, kk, kv, kw = jax.random.split(key, 4)
    q = jax.random.normal(kq, (B, heads, Lq, dim_head), dtype=jnp.float32)
    k = jax.random.normal(kk, (B, heads, Lk, dim_head), dtype=jnp.float32)
    v = jax.random.normal(kv, (B, heads, Lk, dim_head), dtype=jnp.float32)
    # nn.Linear(_dim, dim, bias=False).weight -> [dim, _dim], used untransposed.
    w0 = jax.random.normal(kw, (dim, heads * dim_head), dtype=jnp.float32) * 0.05

    out = multi_head_cross_attention(q, k, v, w0, mask=None)
    out = jax.block_until_ready(out)

    ref = reference(q, k, v, w0, mask=None)
    # Slightly loose tolerance: pl.reciprocal(approx=True) in the softmax denom.
    np.testing.assert_allclose(np.asarray(out), np.asarray(ref), rtol=2e-3, atol=2e-3)

    print("KERNEL_OK")
</pallas_src>

<mosaic_0001>
module attributes {stable_mosaic.version = 11 : i64} {
  func.func @_fused_mhca_kernel(%arg0: i32, %arg1: memref<1x4x8x8xf32, #tpu.memory_space<vmem>>, %arg2: memref<1x4x8x8xf32, #tpu.memory_space<vmem>>, %arg3: memref<1x4x8x8xf32, #tpu.memory_space<vmem>>, %arg4: memref<32x32xf32, #tpu.memory_space<vmem>>, %arg5: memref<1x8x32xf32, #tpu.memory_space<vmem>>) attributes {dimension_semantics = [#tpu.dimension_semantics<parallel>], iteration_bounds = array<i64: 2>, scalar_prefetch = 0 : i64, scratch_operands = 0 : i64, tpu.core_type = #tpu.core_type<tc>, window_params = [{transform_indices = @transform_0, window_bounds = array<i64: 1, 4, 8, 8>}, {transform_indices = @transform_1, window_bounds = array<i64: 1, 4, 8, 8>}, {transform_indices = @transform_2, window_bounds = array<i64: 1, 4, 8, 8>}, {pipeline_mode = #tpu.pipeline_mode<synchronous>, transform_indices = @transform_3, window_bounds = array<i64: 32, 32>}, {transform_indices = @transform_4, window_bounds = array<i64: 1, 8, 32>}]} {
    %c0 = arith.constant 0 : index
    %c0_0 = arith.constant 0 : index
    %c0_1 = arith.constant 0 : index
    %c0_2 = arith.constant 0 : index
    %0 = vector.load %arg1[%c0, %c0_0, %c0_1, %c0_2] : memref<1x4x8x8xf32, #tpu.memory_space<vmem>>, vector<1x1x8x8xf32>
    %1 = vector.shape_cast %0 : vector<1x1x8x8xf32> to vector<8x8xf32>
    %cst = arith.constant 0.353553385 : f32
    %2 = vector.broadcast %cst : f32 to vector<8x8xf32>
    %3 = arith.mulf %1, %2 : vector<8x8xf32>
    %c0_3 = arith.constant 0 : index
    %c0_4 = arith.constant 0 : index
    %c0_5 = arith.constant 0 : index
    %c0_6 = arith.constant 0 : index
    %4 = vector.load %arg2[%c0_3, %c0_4, %c0_5, %c0_6] : memref<1x4x8x8xf32, #tpu.memory_space<vmem>>, vector<1x1x8x8xf32>
    %5 = vector.shape_cast %4 : vector<1x1x8x8xf32> to vector<8x8xf32>
    %c0_7 = arith.constant 0 : index
    %c0_8 = arith.constant 0 : index
    %c0_9 = arith.constant 0 : index
    %c0_10 = arith.constant 0 : index
    %6 = vector.load %arg3[%c0_7, %c0_8, %c0_9, %c0_10] : memref<1x4x8x8xf32, #tpu.memory_space<vmem>>, vector<1x1x8x8xf32>
    %7 = vector.shape_cast %6 : vector<1x1x8x8xf32> to vector<8x8xf32>
    %cst_11 = arith.constant dense<0.000000e+00> : vector<8x8xf32>
    %8 = tpu.matmul %3, %5, %cst_11 {dimension_numbers = #tpu.dot_dimension_numbers<[1], [1], [0], [0], [0, 0, 1, 0], [], []>} : vector<8x8xf32>, vector<8x8xf32>, vector<8x8xf32> -> vector<8x8xf32>
    %cst_12 = arith.constant dense<0xFF800000> : vector<8xf32>
    %9 = vector.multi_reduction <maximumf>, %8, %cst_12 [1] : vector<8x8xf32> to vector<8xf32>
    %10 = vector.shape_cast %9 : vector<8xf32> to vector<8x1xf32>
    %11 = vector.broadcast %10 : vector<8x1xf32> to vector<8x8xf32>
    %12 = arith.subf %8, %11 : vector<8x8xf32>
    %13 = math.exp %12 : vector<8x8xf32>
    %cst_13 = arith.constant dense<0.000000e+00> : vector<8xf32>
    %14 = vector.multi_reduction <add>, %13, %cst_13 [1] : vector<8x8xf32> to vector<8xf32>
    %15 = vector.shape_cast %14 : vector<8xf32> to vector<8x1xf32>
    %16 = tpu.reciprocal %15 {approx = true} : vector<8x1xf32> -> vector<8x1xf32>
    %17 = vector.broadcast %16 : vector<8x1xf32> to vector<8x8xf32>
    %18 = arith.mulf %13, %17 : vector<8x8xf32>
    %cst_14 = arith.constant dense<0.000000e+00> : vector<8x8xf32>
    %19 = tpu.matmul %18, %7, %cst_14 {dimension_numbers = #tpu.dot_dimension_numbers<[1], [0], [0], [1], [0, 0, 1, 1], [], []>} : vector<8x8xf32>, vector<8x8xf32>, vector<8x8xf32> -> vector<8x8xf32>
    %c0_15 = arith.constant 0 : index
    %c1 = arith.constant 1 : index
    %c0_16 = arith.constant 0 : index
    %c0_17 = arith.constant 0 : index
    %20 = vector.load %arg1[%c0_15, %c1, %c0_16, %c0_17] : memref<1x4x8x8xf32, #tpu.memory_space<vmem>>, vector<1x1x8x8xf32>
    %21 = vector.shape_cast %20 : vector<1x1x8x8xf32> to vector<8x8xf32>
    %cst_18 = arith.constant 0.353553385 : f32
    %22 = vector.broadcast %cst_18 : f32 to vector<8x8xf32>
    %23 = arith.mulf %21, %22 : vector<8x8xf32>
    %c0_19 = arith.constant 0 : index
    %c1_20 = arith.constant 1 : index
    %c0_21 = arith.constant 0 : index
    %c0_22 = arith.constant 0 : index
    %24 = vector.load %arg2[%c0_19, %c1_20, %c0_21, %c0_22] : memref<1x4x8x8xf32, #tpu.memory_space<vmem>>, vector<1x1x8x8xf32>
    %25 = vector.shape_cast %24 : vector<1x1x8x8xf32> to vector<8x8xf32>
    %c0_23 = arith.constant 0 : index
    %c1_24 = arith.constant 1 : index
    %c0_25 = arith.constant 0 : index
    %c0_26 = arith.constant 0 : index
    %26 = vector.load %arg3[%c0_23, %c1_24, %c0_25, %c0_26] : memref<1x4x8x8xf32, #tpu.memory_space<vmem>>, vector<1x1x8x8xf32>
    %27 = vector.shape_cast %26 : vector<1x1x8x8xf32> to vector<8x8xf32>
    %cst_27 = arith.constant dense<0.000000e+00> : vector<8x8xf32>
    %28 = tpu.matmul %23, %25, %cst_27 {dimension_numbers = #tpu.dot_dimension_numbers<[1], [1], [0], [0], [0, 0, 1, 0], [], []>} : vector<8x8xf32>, vector<8x8xf32>, vector<8x8xf32> -> vector<8x8xf32>
    %cst_28 = arith.constant dense<0xFF800000> : vector<8xf32>
    %29 = vector.multi_reduction <maximumf>, %28, %cst_28 [1] : vector<8x8xf32> to vector<8xf32>
    %30 = vector.shape_cast %29 : vector<8xf32> to vector<8x1xf32>
    %31 = vector.broadcast %30 : vector<8x1xf32> to vector<8x8xf32>
    %32 = arith.subf %28, %31 : vector<8x8xf32>
    %33 = math.exp %32 : vector<8x8xf32>
    %cst_29 = arith.constant dense<0.000000e+00> : vector<8xf32>
    %34 = vector.multi_reduction <add>, %33, %cst_29 [1] : vector<8x8xf32> to vector<8xf32>
    %35 = vector.shape_cast %34 : vector<8xf32> to vector<8x1xf32>
    %36 = tpu.reciprocal %35 {approx = true} : vector<8x1xf32> -> vector<8x1xf32>
    %37 = vector.broadcast %36 : vector<8x1xf32> to vector<8x8xf32>
    %38 = arith.mulf %33, %37 : vector<8x8xf32>
    %cst_30 = arith.constant dense<0.000000e+00> : vector<8x8xf32>
    %39 = tpu.matmul %38, %27, %cst_30 {dimension_numbers = #tpu.dot_dimension_numbers<[1], [0], [0], [1], [0, 0, 1, 1], [], []>} : vector<8x8xf32>, vector<8x8xf32>, vector<8x8xf32> -> vector<8x8xf32>
    %c0_31 = arith.constant 0 : index
    %c2 = arith.constant 2 : index
    %c0_32 = arith.constant 0 : index
    %c0_33 = arith.constant 0 : index
    %40 = vector.load %arg1[%c0_31, %c2, %c0_32, %c0_33] : memref<1x4x8x8xf32, #tpu.memory_space<vmem>>, vector<1x1x8x8xf32>
    %41 = vector.shape_cast %40 : vector<1x1x8x8xf32> to vector<8x8xf32>
    %cst_34 = arith.constant 0.353553385 : f32
    %42 = vector.broadcast %cst_34 : f32 to vector<8x8xf32>
    %43 = arith.mulf %41, %42 : vector<8x8xf32>
    %c0_35 = arith.constant 0 : index
    %c2_36 = arith.constant 2 : index
    %c0_37 = arith.constant 0 : index
    %c0_38 = arith.constant 0 : index
    %44 = vector.load %arg2[%c0_35, %c2_36, %c0_37, %c0_38] : memref<1x4x8x8xf32, #tpu.memory_space<vmem>>, vector<1x1x8x8xf32>
    %45 = vector.shape_cast %44 : vector<1x1x8x8xf32> to vector<8x8xf32>
    %c0_39 = arith.constant 0 : index
    %c2_40 = arith.constant 2 : index
    %c0_41 = arith.constant 0 : index
    %c0_42 = arith.constant 0 : index
    %46 = vector.load %arg3[%c0_39, %c2_40, %c0_41, %c0_42] : memref<1x4x8x8xf32, #tpu.memory_space<vmem>>, vector<1x1x8x8xf32>
    %47 = vector.shape_cast %46 : vector<1x1x8x8xf32> to vector<8x8xf32>
    %cst_43 = arith.constant dense<0.000000e+00> : vector<8x8xf32>
    %48 = tpu.matmul %43, %45, %cst_43 {dimension_numbers = #tpu.dot_dimension_numbers<[1], [1], [0], [0], [0, 0, 1, 0], [], []>} : vector<8x8xf32>, vector<8x8xf32>, vector<8x8xf32> -> vector<8x8xf32>
    %cst_44 = arith.constant dense<0xFF800000> : vector<8xf32>
    %49 = vector.multi_reduction <maximumf>, %48, %cst_44 [1] : vector<8x8xf32> to vector<8xf32>
    %50 = vector.shape_cast %49 : vector<8xf32> to vector<8x1xf32>
    %51 = vector.broadcast %50 : vector<8x1xf32> to vector<8x8xf32>
    %52 = arith.subf %48, %51 : vector<8x8xf32>
    %53 = math.exp %52 : vector<8x8xf32>
    %cst_45 = arith.constant dense<0.000000e+00> : vector<8xf32>
    %54 = vector.multi_reduction <add>, %53, %cst_45 [1] : vector<8x8xf32> to vector<8xf32>
    %55 = vector.shape_cast %54 : vector<8xf32> to vector<8x1xf32>
    %56 = tpu.reciprocal %55 {approx = true} : vector<8x1xf32> -> vector<8x1xf32>
    %57 = vector.broadcast %56 : vector<8x1xf32> to vector<8x8xf32>
    %58 = arith.mulf %53, %57 : vector<8x8xf32>
    %cst_46 = arith.constant dense<0.000000e+00> : vector<8x8xf32>
    %59 = tpu.matmul %58, %47, %cst_46 {dimension_numbers = #tpu.dot_dimension_numbers<[1], [0], [0], [1], [0, 0, 1, 1], [], []>} : vector<8x8xf32>, vector<8x8xf32>, vector<8x8xf32> -> vector<8x8xf32>
    %c0_47 = arith.constant 0 : index
    %c3 = arith.constant 3 : index
    %c0_48 = arith.constant 0 : index
    %c0_49 = arith.constant 0 : index
    %60 = vector.load %arg1[%c0_47, %c3, %c0_48, %c0_49] : memref<1x4x8x8xf32, #tpu.memory_space<vmem>>, vector<1x1x8x8xf32>
    %61 = vector.shape_cast %60 : vector<1x1x8x8xf32> to vector<8x8xf32>
    %cst_50 = arith.constant 0.353553385 : f32
    %62 = vector.broadcast %cst_50 : f32 to vector<8x8xf32>
    %63 = arith.mulf %61, %62 : vector<8x8xf32>
    %c0_51 = arith.constant 0 : index
    %c3_52 = arith.constant 3 : index
    %c0_53 = arith.constant 0 : index
    %c0_54 = arith.constant 0 : index
    %64 = vector.load %arg2[%c0_51, %c3_52, %c0_53, %c0_54] : memref<1x4x8x8xf32, #tpu.memory_space<vmem>>, vector<1x1x8x8xf32>
    %65 = vector.shape_cast %64 : vector<1x1x8x8xf32> to vector<8x8xf32>
    %c0_55 = arith.constant 0 : index
    %c3_56 = arith.constant 3 : index
    %c0_57 = arith.constant 0 : index
    %c0_58 = arith.constant 0 : index
    %66 = vector.load %arg3[%c0_55, %c3_56, %c0_57, %c0_58] : memref<1x4x8x8xf32, #tpu.memory_space<vmem>>, vector<1x1x8x8xf32>
    %67 = vector.shape_cast %66 : vector<1x1x8x8xf32> to vector<8x8xf32>
    %cst_59 = arith.constant dense<0.000000e+00> : vector<8x8xf32>
    %68 = tpu.matmul %63, %65, %cst_59 {dimension_numbers = #tpu.dot_dimension_numbers<[1], [1], [0], [0], [0, 0, 1, 0], [], []>} : vector<8x8xf32>, vector<8x8xf32>, vector<8x8xf32> -> vector<8x8xf32>
    %cst_60 = arith.constant dense<0xFF800000> : vector<8xf32>
    %69 = vector.multi_reduction <maximumf>, %68, %cst_60 [1] : vector<8x8xf32> to vector<8xf32>
    %70 = vector.shape_cast %69 : vector<8xf32> to vector<8x1xf32>
    %71 = vector.broadcast %70 : vector<8x1xf32> to vector<8x8xf32>
    %72 = arith.subf %68, %71 : vector<8x8xf32>
    %73 = math.exp %72 : vector<8x8xf32>
    %cst_61 = arith.constant dense<0.000000e+00> : vector<8xf32>
    %74 = vector.multi_reduction <add>, %73, %cst_61 [1] : vector<8x8xf32> to vector<8xf32>
    %75 = vector.shape_cast %74 : vector<8xf32> to vector<8x1xf32>
    %76 = tpu.reciprocal %75 {approx = true} : vector<8x1xf32> -> vector<8x1xf32>
    %77 = vector.broadcast %76 : vector<8x1xf32> to vector<8x8xf32>
    %78 = arith.mulf %73, %77 : vector<8x8xf32>
    %cst_62 = arith.constant dense<0.000000e+00> : vector<8x8xf32>
    %79 = tpu.matmul %78, %67, %cst_62 {dimension_numbers = #tpu.dot_dimension_numbers<[1], [0], [0], [1], [0, 0, 1, 1], [], []>} : vector<8x8xf32>, vector<8x8xf32>, vector<8x8xf32> -> vector<8x8xf32>
    %80 = tpu.concatenate %19, %39, %59, %79 in 1 : vector<8x8xf32>, vector<8x8xf32>, vector<8x8xf32>, vector<8x8xf32> -> vector<8x32xf32>
    %c0_63 = arith.constant 0 : index
    %c0_64 = arith.constant 0 : index
    %81 = vector.load %arg4[%c0_63, %c0_64] : memref<32x32xf32, #tpu.memory_space<vmem>>, vector<32x32xf32>
    %cst_65 = arith.constant dense<0.000000e+00> : vector<8x32xf32>
    %82 = tpu.matmul %80, %81, %cst_65 {dimension_numbers = #tpu.dot_dimension_numbers<[1], [1], [0], [0], [0, 0, 1, 0], [], []>} : vector<8x32xf32>, vector<32x32xf32>, vector<8x32xf32> -> vector<8x32xf32>
    %c0_66 = arith.constant 0 : index
    %c0_67 = arith.constant 0 : index
    %c0_68 = arith.constant 0 : index
    %83 = vector.load %arg5[%c0_66, %c0_67, %c0_68] : memref<1x8x32xf32, #tpu.memory_space<vmem>>, vector<1x8x32xf32>
    %84 = vector.shape_cast %83 : vector<1x8x32xf32> to vector<8x32xf32>
    %85 = vector.shape_cast %82 : vector<8x32xf32> to vector<1x8x32xf32>
    tpu.vector_store %arg5[%c0_66, %c0_67, %c0_68], %85 {strides = array<i32>} : memref<1x8x32xf32, #tpu.memory_space<vmem>>, vector<1x8x32xf32>,
    return
  }
  func.func @transform_0(%arg0: i32) -> (i32, i32, i32, i32) {
    %c0_i32 = arith.constant 0 : i32
    %c0_i32_0 = arith.constant 0 : i32
    %c0_i32_1 = arith.constant 0 : i32
    %c0_i32_2 = arith.constant 0 : i32
    return %arg0, %c0_i32, %c0_i32_0, %c0_i32_1 : i32, i32, i32, i32
  }
  func.func @transform_1(%arg0: i32) -> (i32, i32, i32, i32) {
    %c0_i32 = arith.constant 0 : i32
    %c0_i32_0 = arith.constant 0 : i32
    %c0_i32_1 = arith.constant 0 : i32
    %c0_i32_2 = arith.constant 0 : i32
    return %arg0, %c0_i32, %c0_i32_0, %c0_i32_1 : i32, i32, i32, i32
  }
  func.func @transform_2(%arg0: i32) -> (i32, i32, i32, i32) {
    %c0_i32 = arith.constant 0 : i32
    %c0_i32_0 = arith.constant 0 : i32
    %c0_i32_1 = arith.constant 0 : i32
    %c0_i32_2 = arith.constant 0 : i32
    return %arg0, %c0_i32, %c0_i32_0, %c0_i32_1 : i32, i32, i32, i32
  }
  func.func @transform_3(%arg0: i32) -> (i32, i32) {
    %c0_i32 = arith.constant 0 : i32
    %c0_i32_0 = arith.constant 0 : i32
    %c0_i32_1 = arith.constant 0 : i32
    return %c0_i32, %c0_i32_0 : i32, i32
  }
  func.func @transform_4(%arg0: i32) -> (i32, i32, i32) {
    %c0_i32 = arith.constant 0 : i32
    %c0_i32_0 = arith.constant 0 : i32
    %c0_i32_1 = arith.constant 0 : i32
    return %arg0, %c0_i32, %c0_i32_0 : i32, i32, i32
  }
}

</mosaic_0001>

<bundles_post_ra>
// kernel: tpu_custom_call.1
= control target key start
LH: loop header
LB: loop body
LE: loop exit
PB: predicated region body
PF: predicated region fallthrough
CT: control target
= control target key end

     0   :  { %s2044_s0 = inlined_call_operand.hbm [shape: f32[2,4,8,8], index: 0, kind: input, shape index: {}]   ;;  %s2045_s1 = inlined_call_operand.hbm [shape: f32[2,4,8,8], index: 1, kind: input, shape index: {}]   ;;  %s2046_s2 = inlined_call_operand.hbm [shape: f32[2,4,8,8], index: 2, kind: input, shape index: {}]   ;;  %s2047_s3 = inlined_call_operand.hbm [shape: f32[32,32], index: 3, kind: input, shape index: {}]   ;;  %s2048_s4 = inlined_call_operand.hbm [shape: f32[2,8,32], index: 4, kind: output, shape index: {}]  }
   0x1   :  { %2067 = sst [smem:[#allocation20_spill]] %s2044_s0 }
   0x2   :  { %2068 = sst [smem:[#allocation21_spill]] %s2045_s1 }
   0x3   :  { %9 = vsyncpa [#allocation3], 0 }
   0x4   :  { %11 = vsyncpa [#allocation3 + $0x1], 0 }
   0x5   :  { %12 = vsyncpa [#allocation6], 0 }
   0x6   :  { %14 = vsyncpa [#allocation6 + $0x1], 0 }
   0x7   :  { %15 = vsyncpa [#allocation9], 0 }
   0x8   :  { %16 = vsyncpa [#allocation4], 0 }
   0x9   :  { %18 = vsyncpa [#allocation4 + $0x1], 0  ;;  %s1674_s15 = smov 0   ;;  %s1676_s16 = smov 0  }
   0xa   :  { %s1678_s17 = smov 0   ;;  %s1680_s18 = smov 0  }
   0xb LB: > { %2069 = sst [smem:[#allocation15_spill]] %s1630_s17  ;;  %s1695_s19 = sadd.s32 1, %s1634_s18   ;;  %s1634_s18 = sphi %s1680_s18, %s2098_s18   ;;  %s1630_s17 = sphi %s1678_s17, %s2100_s17   ;;  %s1626_s16 = sphi %s1676_s16, %s2102_s16   ;;  %s1622_s15 = sphi %s1674_s15, %s2101_s15  }
   0xc   : > { %2070 = sst [smem:[#allocation16_spill]] %s1634_s18  ;;  %s31_s20 = sadd.s32 1, %s1630_s17 }
   0xd   : > { %2071 = sst [smem:[#allocation17_spill]] %s1695_s19  ;;  %s28_s21 = ssub.s32 %s1634_s18, %s1695_s19 }
   0xe   : > { %p2049_p0 = scmp.ne.s32.totalorder %s1630_s17, %s1626_s16  ;;  %p29_p1 = scmp.eq.s32.totalorder %s28_s21, 0 }
   0xf   : > { %p39_p2 = scmp.eq.s32.totalorder %s1634_s18, 0  ;;  %p1382_p5 = scmp.lt.s32.totalorder %s1634_s18, 2 }
  0x10   : > { %s1704_s22 = scalar_select %p29_p1, %s1630_s17, %s31_s20  }
  0x11   : > { %p40_p3 = por %p39_p2, %p2049_p0  ;;  %s180_s23 = sand.u32 1, %s1630_s17  }
  0x12   : > { %2072 = sst [smem:[#allocation18_spill]] %s1704_s22  ;;  %s1714_s24 = sshll.u32 %s180_s23, 5 }
  0x13   : > { %s1717_s25 = sshll.u32 %s1634_s18, 9  ;;  %p1719_p6 = pnand %p1382_p5, %p40_p3 }
  0x14   : > { %s201_s27 = sand.u32 1, %s1634_s18   ;;  %s2074_s1 = sld [smem:[#allocation21_spill]] }
  0x15   : > { %s2073_s26 = scalar_select %p1719_p6, 1, 0 }
  0x16   : > { %s205_s5 = scalar_lea.vmem [#allocation5], %s1714_s24  ;;  %s1733_s7 = scalar_lea.sflag [#allocation6], %s201_s27 }
  0x17   : > { %s212_s6 = sshll.u32 %s205_s5, 4  ;;  %p1739_p8 = pneg %p1719_p6  ;;  %s1731_s6 = int_to_ptr.vmem [resolvable:$true] %s212_s6 }
  0x19   : > { %s2075_s9 = scalar_select %p1739_p8, 1, 0 }
  0x1a   : > { %s1728_s30 = scalar_lea.hbm %s2074_s1, %s1717_s25  ;;  %s1447_s12 = scalar_lea.hbm %s2074_s1, 1024 }
  0x1b   : > { %s1442_s8 = scalar_lea.hbm %s1728_s30, 512  ;;  %p1448_p11 = scmp.lt.u32.totalorder %s1728_s30, %s2074_s1 }
  0x1c   : > { %p1443_p7 = scmp.ne.s32.totalorder %s1728_s30, %s1442_s8  ;;  %p1449_p12 = scmp.lt.u32.totalorder %s1447_s12, %s1442_s8 }
  0x1d   : > { %p1451_p1 = scmp.lt.u32.totalorder %s1442_s8, %s1728_s30 }
  0x1e   : > { %p1445_p9 = pnand %p1739_p8, %p1443_p7  ;;  %p1450_p13 = por %p1449_p12, %p1448_p11 }
  0x20   : > { %p1446_p10 = pneg %p1445_p9  ;;  %p1452_p2 = por %p1451_p1, %p1450_p13 }
  0x22   : > { %p1453_p3 = pnand %p1452_p2, %p1446_p10 }
  0x24   : > { %1456 = shalt.err (!%p1453_p3)
}
  0x25   : > { %s1457_s20 = scalar_lea.vmem %s1731_s6, 512  ;;  %s1636_s21 = smov [#allocation5]  }
  0x26   : > { %p1458_p5 = scmp.ne.s32.totalorder %s1731_s6, %s1457_s20  ;;  %s1462_s27 = sshll.u32 %s1636_s21, 4  ;;  %s1463_s27 = int_to_ptr.vmem [resolvable:$false] %s1462_s27 }
  0x27   : > { %s1464_s28 = scalar_lea.vmem %s1463_s27, 1024  ;;  %p1465_p4 = scmp.lt.s32.totalorder %s1731_s6, %s1463_s27 }
  0x28   : > { %p1460_p7 = pnand %p1458_p5, %p1739_p8  ;;  %p1466_p0 = scmp.lt.s32.totalorder %s1464_s28, %s1457_s20 }
  0x2a   : > { %p1461_p9 = pneg %p1460_p7  ;;  %p1467_p11 = por %p1466_p0, %p1465_p4 }
  0x2c   : > { %p1468_p12 = pnand %p1467_p11, %p1461_p9 }
  0x2e   : > { %1471 = shalt.err (!%p1468_p12)
}
  0x2f   : > { %s2050_s29 = smov 128   ;;  %s2052_s5 = smov 8  }
  0x30   : > { %1373 = dma.hbm_to_vmem [thread:$0]  (!%p1719_p6), %s1728_s30, 512, %s1731_s6, %s1733_s7, %s2050_s29, %s2050_s29, %s2052_s5  }
  0x31   : > { %s1767_s8 = sadd.s32 4294967295, %s1634_s18   ;;  %s1219_s10 = sadd.s32 4294967294, %s1634_s18  }
  0x32   : > { %p44_p0 = scmp.ne.s32.totalorder %s1626_s16, %s1622_s15  ;;  %p2054_p4 = scmp.eq.s32.totalorder %s1767_s8, 0 }
  0x33   : > { %p141_p10 = scmp.eq.s32.totalorder %s1767_s8, 1  ;;  %p147_p13 = scmp.eq.s32.totalorder %s1219_s10, 1 }
  0x34   : > { %p1776_p1 = por %p2054_p4, %p44_p0  ;;  %p1220_p2 = scmp.ge.s32.totalorder %s1634_s18, 1 }
  0x35   : > { %p2077_p3 = scmp.ne.s32.totalorder %s1630_s17, %s1626_s16  ;;  %p1788_p7 = por %p147_p13, %p44_p0 }
  0x36   : > { %s2076_s11 = scalar_select %p1776_p1, 1, 0 }
  0x37   : > { %p1784_p5 = por %p141_p10, %p2077_p3  ;;  %p154_p9 = scmp.lt.s32.totalorder %s1634_s18, 3 }
  0x38   : > { %s2079_s6 = scalar_select %p1788_p7, 1, 0 }
  0x39   : > { %s2078_s30 = scalar_select %p1784_p5, 1, 0 }
  0x3a   : > { %2080 = sst [smem:[#allocation19_spill]] %s2079_s6  ;;  %p1793_p11 = pnand %p1220_p2, %p154_p9 }
  0x3b   : > { %s1639_s13 = smov [#allocation8]   ;;  %s2082_s0 = sld [smem:[#allocation20_spill]] }
  0x3c   : > { %s2081_s12 = scalar_select %p1793_p11, 1, 0 }
  0x3d   : > { %s166_s14 = sshll.u32 %s1639_s13, 4  ;;  %p1363_p12 = pneg %p1793_p11  ;;  %s1797_s14 = int_to_ptr.vmem [resolvable:$true] %s166_s14 }
  0x3e   : > { %s184_s28 = scalar_lea.vmem [#allocation2], %s1714_s24  ;;  %s1818_s13 = scalar_lea.sflag [#allocation3], %s180_s23 }
  0x3f   : > { %s191_s10 = sshll.u32 %s184_s28, 4  ;;  %p1810_p0 = pnand %p1363_p12, %p2054_p4  ;;  %s1814_s10 = int_to_ptr.vmem [resolvable:$true] %s191_s10 }
  0x41   : > { %s1805_s27 = scalar_lea.hbm %s2082_s0, %s1717_s25  ;;  %s1477_s1 = scalar_lea.hbm %s2082_s0, 1024 }
  0x42   : > { %s2083_s29 = scalar_select %p1810_p0, 1, 0 }
  0x43   : > { %s1472_s5 = scalar_lea.hbm %s1805_s27, 512  ;;  %p1478_p3 = scmp.lt.u32.totalorder %s1805_s27, %s2082_s0 }
  0x44   : > { %p1473_p10 = scmp.ne.s32.totalorder %s1805_s27, %s1472_s5  ;;  %p1479_p9 = scmp.lt.u32.totalorder %s1477_s1, %s1472_s5 }
  0x45   : > { %p1481_p4 = scmp.lt.u32.totalorder %s1472_s5, %s1805_s27 }
  0x46   : > { %p1475_p13 = pnand %p1473_p10, %p1739_p8  ;;  %p1480_p12 = por %p1479_p9, %p1478_p3 }
  0x48   : > { %p1476_p2 = pneg %p1475_p13  ;;  %p1482_p7 = por %p1481_p4, %p1480_p12 }
  0x4a   : > { %p1483_p5 = pnand %p1482_p7, %p1476_p2 }
  0x4c   : > { %1486 = shalt.err (!%p1483_p5)
}
  0x4d   : > { %s1487_s23 = scalar_lea.vmem %s1814_s10, 512  ;;  %s1640_s20 = smov [#allocation2]  }
  0x4e   : > { %p1488_p10 = scmp.ne.s32.totalorder %s1814_s10, %s1487_s23  ;;  %s1492_s21 = sshll.u32 %s1640_s20, 4  ;;  %s1493_s21 = int_to_ptr.vmem [resolvable:$false] %s1492_s21 }
  0x4f   : > { %s1494_s22 = scalar_lea.vmem %s1493_s21, 1024  ;;  %p1495_p11 = scmp.lt.s32.totalorder %s1814_s10, %s1493_s21 }
  0x50   : > { %p1490_p13 = pnand %p1488_p10, %p1739_p8  ;;  %p1496_p0 = scmp.lt.s32.totalorder %s1494_s22, %s1487_s23 }
  0x52   : > { %p1491_p1 = pneg %p1490_p13  ;;  %p1497_p3 = por %p1496_p0, %p1495_p11 }
  0x54   : > { %p1498_p9 = pnand %p1497_p3, %p1491_p1 }
  0x56   : > { %1501 = shalt.err (!%p1498_p9)
}
  0x57   : > { %s2084_s1 = smov 8   ;;  %s2085_s5 = smov 128  }
  0x58   : > { %1370 = dma.hbm_to_vmem [thread:$0]  (!%p1719_p6), %s1805_s27, 512, %s1814_s10, %s1818_s13, %s2085_s5, %s2085_s5, %s2084_s1  }
  0x59   : > { %s1849_s0 = scalar_lea.hbm %s2046_s2, %s1717_s25  ;;  %s1502_s22 = scalar_lea.hbm %s2047_s3, 512 }
  0x5a   : > { %p1503_p4 = scmp.ne.s32.totalorder %s2047_s3, %s1502_s22  ;;  %p2086_p1 = scmp.ne.s32.totalorder %s2083_s29, 0 }
  0x5b   : > { %p1509_p0 = scmp.lt.u32.totalorder %s1502_s22, %s2047_s3 }
  0x5c   : > { %p1504_p5 = pneg %p2086_p1 }
  0x5e   : > { %p1505_p7 = pnand %p1504_p5, %p1503_p4 }
  0x60   : > { %p1506_p11 = pneg %p1505_p7 }
  0x62   : > { %p1511_p2 = pnand %p1509_p0, %p1506_p11 }
  0x64   : > { %1514 = shalt.err (!%p1511_p2)
}
  0x65   : > { %s1515_s25 = scalar_lea.vmem %s1797_s14, 512  ;;  %p1523_p3 = scmp.lt.s32.totalorder %s1797_s14, %s1797_s14 }
  0x66   : > { %p1516_p12 = scmp.ne.s32.totalorder %s1797_s14, %s1515_s25  ;;  %p1524_p9 = scmp.lt.s32.totalorder %s1515_s25, %s1515_s25 }
  0x68   : > { %p1518_p10 = pnand %p1516_p12, %p1504_p5  ;;  %p1525_p6 = por %p1524_p9, %p1523_p3 }
  0x6a   : > { %p1519_p13 = pneg %p1518_p10 }
  0x6c   : > { %p1526_p8 = pnand %p1525_p6, %p1519_p13 }
  0x6e   : > { %1529 = shalt.err (!%p1526_p8)
}
  0x6f   : > { %1366 = dma.hbm_to_vmem [thread:$0]  (!%p2086_p1), %s2047_s3, 512, %s1797_s14, [#allocation9], %s2085_s5, %s2085_s5, %s2084_s1  }
  0x70   : > { %s226_s19 = scalar_lea.vmem [#allocation7], %s1714_s24  ;;  %s1530_s27 = scalar_lea.hbm %s1849_s0, 512 }
  0x71   : > { %s233_s6 = sshll.u32 %s226_s19, 4  ;;  %p1531_p6 = scmp.ne.s32.totalorder %s1849_s0, %s1530_s27  ;;  %s1876_s6 = int_to_ptr.vmem [resolvable:$true] %s233_s6 }
  0x72   : > { %p2087_p8 = scmp.ne.s32.totalorder %s2075_s9, 0  ;;  %s1535_s13 = scalar_lea.hbm %s2046_s2, 1024 }
  0x73   : > { %p1536_p7 = scmp.lt.u32.totalorder %s1849_s0, %s2046_s2  ;;  %p1537_p11 = scmp.lt.u32.totalorder %s1535_s13, %s1530_s27 }
  0x74   : > { %p1533_p4 = pnand %p1531_p6, %p2087_p8  ;;  %p1539_p1 = scmp.lt.u32.totalorder %s1530_s27, %s1849_s0 }
  0x75   : > { %p1538_p0 = por %p1537_p11, %p1536_p7 }
  0x76   : > { %p1534_p5 = pneg %p1533_p4 }
  0x77   : > { %p1540_p2 = por %p1539_p1, %p1538_p0 }
  0x79   : > { %p1541_p12 = pnand %p1540_p2, %p1534_p5 }
  0x7b   : > { %1544 = shalt.err (!%p1541_p12)
}
  0x7c   : > { %s1545_s24 = scalar_lea.vmem %s1876_s6, 512  ;;  %s1641_s14 = smov [#allocation7]  }
  0x7d   : > { %p1546_p10 = scmp.ne.s32.totalorder %s1876_s6, %s1545_s24  ;;  %s1550_s23 = sshll.u32 %s1641_s14, 4  ;;  %s1551_s23 = int_to_ptr.vmem [resolvable:$false] %s1550_s23 }
  0x7e   : > { %s1552_s21 = scalar_lea.vmem %s1551_s23, 1024  ;;  %p1553_p9 = scmp.lt.s32.totalorder %s1876_s6, %s1551_s23 }
  0x7f   : > { %p1548_p13 = pnand %p1546_p10, %p2087_p8  ;;  %p1554_p6 = scmp.lt.s32.totalorder %s1552_s21, %s1545_s24 }
  0x81   : > { %p1549_p3 = pneg %p1548_p13  ;;  %p1555_p4 = por %p1554_p6, %p1553_p9 }
  0x83   : > { %p1556_p7 = pnand %p1555_p4, %p1549_p3 }
  0x85   : > { %1559 = shalt.err (!%p1556_p7)
}
  0x86   : > { %p2088_p5 = scmp.ne.s32.totalorder %s2073_s26, 0  ;;  %p2089_p8 = scmp.ne.s32.totalorder %s2081_s12, 0 }
  0x87   : > { %s1906_s9 = sand.u32 (!%p2089_p8), 1, %s1626_s16   ;;  %p2090_p11 = scmp.ne.s32.totalorder (!%p2089_p8), %s2076_s11, 0 }
  0x88   : > { %1376 = dma.hbm_to_vmem [thread:$0]  (!%p2088_p5), %s1849_s0, 512, %s1876_s6, %s1733_s7, %s2085_s5, %s2085_s5, %s2084_s1  }
  0x89   : > { %245 = sbr.rel (%p2089_p8) target bundleno = 1775 (0x6ef), region = 36  ;;  %s1233_s22 = sshll.u32 (!%p2089_p8), %s1906_s9, 5 }
  0x8a   : > { %s248_s25 = scalar_lea.sflag (!%p2089_p8), [#allocation3], %s1906_s9  ;;  %s1910_s17 = scalar_lea.vmem (!%p2089_p8), [#allocation2], %s1233_s22 }
  0x90   : > { %1605 = dma.done.wait (%p2090_p11), %s248_s25, 512  }
  0x91   : > { %1607 = vsyncadd (%p2090_p11), %s248_s25, 4294966784  ;;  %s256_s0 = sand.u32 1, %s1767_s8   ;;  %s1917_s7 = scalar_lea.vmem [#allocation5], %s1233_s22 }
  0x92   : > { %s257_s26 = scalar_lea.sflag [#allocation6], %s256_s0 }
  0x93   : > { %1609 = dma.done.wait (%p2090_p11), %s257_s26, 1024  }
  0x94   : > { %1611 = vsyncadd (%p2090_p11), %s257_s26, 4294966272  ;;  %s1923_s12 = scalar_lea.vmem [#allocation7], %s1233_s22  ;;  %p2091_p0 = scmp.eq.s32.totalorder %s1767_s8, 0 }
  0x96   : > { %1613 = dma.done.wait (%p2091_p0), [#allocation9], 512   ;;  %p2092_p1 = pmov %p2091_p0 }
  0x97   : > { %v1642_v0 = vmov 0.0   ;;  %vm1643_vm0 = vmmov 0   ;;  %vm312_vm1 = vcmask 64512   ;;  %v310_v1 = vld [vmem:[%s1917_s7] sm:$0xff]  ;;  %v1248_v7 = vld [vmem:[%s1917_s7 + $0x10] sm:$0xff]  ;;  %v1253_v10 = vld [vmem:[%s1910_s17 + $0x18] sm:$0xff] }
  0x98   : > { %1615 = vsyncadd (%p2092_p1), [#allocation9], 4294966784  ;;  %1292 = vmatprep.subr.mxu0 %v1642_v0  ;;  %1294 = vmatprep.mubr.msk.f32.mxu0 %vm1643_vm0, %v1642_v0  ;;  %v308_v2 = vld [vmem:[%s1910_s17] sm:$0xff]  ;;  %v1247_v8 = vld [vmem:[%s1910_s17 + $0x10] sm:$0xff]  ;;  %v809_v12 = vmul.f32 0.35355338, %v1253_v10 }
  0x99   : > { %1312 = vmatprep.subr.mxu1 %v1642_v0  ;;  %1314 = vmatprep.mubr.msk.f32.mxu1 %vm1643_vm0, %v1642_v0  ;;  %v309_v3 = vmul.f32 0.35355338, %v308_v2  ;;  %v642_v9 = vmul.f32 0.35355338, %v1247_v8  ;;  %v1254_v11 = vld [vmem:[%s1917_s7 + $0x18] sm:$0xff]  ;;  %v311_v18 = vld [vmem:[%s1923_s12] sm:$0xff] }
  0x9a   : > { %1293 = vmatpush3.xpose.msk.msra.mxu0 %vm312_vm1, %v310_v1  ;;  %1313 = vmatpush3.xpose.msk.msra.mxu1 %vm312_vm1, %v1248_v7  ;;  %v1241_v26 = vld [vmem:[%s1910_s17 + $0x8] sm:$0xff]  ;;  %v1249_v57 = vld [vmem:[%s1923_s12 + $0x10] sm:$0xff]  ;;  %v1255_v60 = vld [vmem:[%s1923_s12 + $0x18] sm:$0xff]  ;;  %vm995_vm2 = vcmask 261120   ;;  %v1644_v2 = vmov 0.0|0.0   ;;  %s1645_s11 = smov 8  }
  0x9b   : > { %1297 = vmatprep.subr.mxu0 %v1642_v0  ;;  %1322 = vmatprep.subr.mxu1 %v1642_v0  ;;  %v1242_v28 = vld [vmem:[%s1917_s7 + $0x8] sm:$0xff]  ;;  %v475_v29 = vmul.f32 0.35355338, %v1241_v26  ;;  %v991_v63 = vld [vmem:[#allocation8] sm:$0xff]  ;;  %vm1345_vm3 = vmpackc.low %vm995_vm2, %vm995_vm2  ;;  %s1646_s1 = smov 16   ;;  %s1647_s5 = smov 24  }
  0x9c   : > { %v1243_v51 = vld [vmem:[%s1923_s12 + $0x8] sm:$0xff]  ;;  %vm987_vm4 = vcmask 130048   ;;  %vm989_vm5 = vcmask 195584   ;;  %s1237_s18 = sshll.u32 %s1906_s9, 3  ;;  %s1265_s19 = sshll.u32 %s1767_s8, 7 }
  0x9d   : > { %1295 = vmatmul.mubr.msk.f32.vlgmr.msra.gmra.mrb[0].mxu0 %vm312_vm1, %v309_v3  ;;  %1315 = vmatmul.mubr.msk.f32.vlgmr.msra.gmra.mrb[0].mxu1 %vm312_vm1, %v642_v9  ;;  %v992_v1 = vld [vmem:[#allocation8 + $0x8] sm:$0xff]  ;;  %s307_s6 = scalar_lea.vmem [#allocation10], %s1237_s18  ;;  %s1999_s13 = scalar_lea.hbm %s2048_s4, %s1265_s19 }
  0x9e   : > { %1299 = vmatprep.mubr.msk.f32.mxu0 %vm1643_vm0, %v1642_v0  ;;  %1323 = vmatpush3.xpose.msk.msra.mxu1 %vm312_vm1, %v1254_v11  ;;  %v1344_v3 = vpack.c.bf16 %v992_v1, %v991_v63  ;;  %s1096_s27 = sshll.u32 %s307_s6, 4  ;;  %s1083_s28 = scalar_lea.sflag [#allocation4], %s1906_s9  ;;  %s2001_s27 = int_to_ptr.vmem [resolvable:$true] %s1096_s27 }
  0x9f   : > { %1324 = vmatprep.mubr.msk.f32.mxu1 %vm1643_vm0, %v1642_v0  ;;  %1298 = vmatpush3.msra.mxu0 %v311_v18  ;;  %s1560_s20 = scalar_lea.vmem %s2001_s27, 128  ;;  %p2093_p12 = scmp.ne.s32.totalorder %s2078_s30, 0 }
  0xa0   : > { %1302 = vmatprep.subr.mxu0 %v1642_v0  ;;  %1343 = vmatprep.subr.bf16.mxu1 %v1644_v2  ;;  %p1561_p2 = scmp.ne.s32.totalorder %s2001_s27, %s1560_s20  ;;  %s1648_s8 = smov [#allocation10]  }
  0xa1   : > { %1325 = vmatmul.mubr.msk.f32.vlgmr.msra.gmra.mrb[2].mxu1 %vm312_vm1, %v809_v12  ;;  %s1564_s24 = sshll.u32 %s1648_s8, 4  ;;  %s1565_s24 = int_to_ptr.vmem [resolvable:$false] %s1564_s24 }
  0xa2   : > { %1340 = vmatprep.mubr.msk.f32.mxu1 %vm1643_vm0, %v1642_v0  ;;  %1346 = vmatpush3.bf16.xpose.msk.msra.mxu1 %vm1345_vm3, %v1344_v3  ;;  %p1562_p10 = pnand %p1561_p2, %p2093_p12  ;;  %s1566_s14 = scalar_lea.vmem %s1565_s24, 256 }
  0xa3   : > { %1347 = vmatprep.subr.bf16.mxu1 %v1644_v2  ;;  %p1567_p3 = scmp.lt.s32.totalorder %s2001_s27, %s1565_s24  ;;  %p1568_p9 = scmp.lt.s32.totalorder %s1566_s14, %s1560_s20 }
  0xa4   : > { %p1563_p13 = pneg %p1562_p10 }
  0xa5   : > { %p1569_p6 = por %p1568_p9, %p1567_p3 }
  0xa7   : > { %p1570_p4 = pnand %p1569_p6, %p1563_p13 }
 0x170   : > { %v385_v4 = vpop.f32.mrb[0].mxu0  ;;  %v719_v19 = vpop.f32.mrb[0].mxu1 }
 0x171   : > { %v1296_v5 = vpop.f32.mrb[1].mxu0  ;;  %v389_v6 = vsel %vm312_vm1, %v385_v4, -inf  ;;  %v1316_v20 = vpop.f32.mrb[1].mxu1  ;;  %v723_v35 = vsel %vm312_vm1, %v719_v19, -inf }
 0x172   : > { %390 = vmax.xlane.f32.xlu0 %v389_v6  ;;  %v994_v5 = vld [vmem:[#allocation8 + $0x18] sm:$0xff] }
 0x174   : > { %v886_v21 = vpop.f32.mrb[2].mxu1 }
 0x175   : > { %v890_v22 = vsel %vm312_vm1, %v886_v21, -inf  ;;  %v1326_v23 = vpop.f32.mrb[3].mxu1 }
 0x1ff   : > { %v391_v13 = vpop.xlane.xlu0 %390 }
 0x200   : > { %v392_v14 = vsub.f32 %v385_v4, %v391_v13  ;;  %v993_v4 = vld [vmem:[#allocation8 + $0x10] sm:$0xff] }
 0x201   : > { %v1348_v6 = vpack.c.bf16 %v994_v5, %v993_v4 }
 0x202   : > { %v393_v15 = vmul.f32 1.442695, %v392_v14 }
 0x203   : > { %1350 = vmatpush3.bf16.xpose.msk.msra.mxu1 %vm1345_vm3, %v1348_v6 }
 0x204   : > { %1426 = vpow2.f32 %v393_v15 }
 0x20e   : > { %v1427_v16 = vpop.eup %1426 }
 0x20f   : > { %v395_v17 = vsel %vm312_vm1, %v1427_v16, 0.0 }
 0x210   : > { %396 = vadd.xlane.f32.xlu0 %v395_v17 }
 0x214   : > { %891 = vmax.xlane.f32.xlu0 %v890_v22 }
 0x29d   : > { %v397_v24 = vpop.xlane.xlu0 %396 }
 0x29e   : > { %1428 = vrcp.f32 %v397_v24 }
 0x2a1   : > { %v892_v36 = vpop.xlane.xlu0 %891 }
 0x2a2   : > { %v893_v37 = vsub.f32 %v886_v21, %v892_v36 }
 0x2a4   : > { %v894_v40 = vmul.f32 1.442695, %v893_v37 }
 0x2a8   : > { %v1429_v25 = vpop.eup %1428 }
 0x2a9   : > { %v399_v27 = vmul.f32 %v1429_v25, %v1427_v16 }
 0x2ab   : > { %1300 = vmatmul.mubr.msk.f32.vlgmr.msra.gmra.mrb[2].mxu0 %vm312_vm1, %v399_v27 }
 0x2ac   : > { %1303 = vmatpush3.xpose.msk.msra.mxu0 %vm312_vm1, %v1242_v28  ;;  %1304 = vmatprep.mubr.msk.f32.mxu0 %vm1643_vm0, %v1642_v0 }
 0x2ad   : > { %1307 = vmatprep.subr.mxu0 %v1642_v0 }
 0x2af   : > { %1305 = vmatmul.mubr.msk.f32.vlgmr.msra.gmra.mrb[4].mxu0 %vm312_vm1, %v475_v29 }
 0x2b0   : > { %1309 = vmatprep.mubr.msk.f32.mxu0 %vm1643_vm0, %v1642_v0  ;;  %1308 = vmatpush3.msra.mxu0 %v1243_v51 }
 0x2b1   : > { %1317 = vmatprep.subr.mxu0 %v1642_v0 }
 0x37e   : > { %v1970_v30 = vpop.f32.mrb[2].mxu0 }
 0x37f   : > { %v1301_v31 = vpop.f32.mrb[3].mxu0 }
 0x382   : > { %v552_v32 = vpop.f32.mrb[4].mxu0 }
 0x383   : > { %v1306_v33 = vpop.f32.mrb[5].mxu0  ;;  %v556_v34 = vsel %vm312_vm1, %v552_v32, -inf }
 0x384   : > { %557 = vmax.xlane.f32.xlu1 %v556_v34 }
 0x388   : > { %724 = vmax.xlane.f32.xlu1 %v723_v35 }
 0x411   : > { %v558_v38 = vpop.xlane.xlu1 %557 }
 0x412   : > { %v559_v39 = vsub.f32 %v552_v32, %v558_v38 }
 0x414   : > { %v560_v41 = vmul.f32 1.442695, %v559_v39 }
 0x415   : > { %v725_v42 = vpop.xlane.xlu1 %724 }
 0x416   : > { %1430 = vpow2.f32 %v560_v41  ;;  %v726_v43 = vsub.f32 %v719_v19, %v725_v42 }
 0x417   : > { %1432 = vpow2.f32 %v894_v40 }
 0x418   : > { %v727_v44 = vmul.f32 1.442695, %v726_v43 }
 0x41a   : > { %1434 = vpow2.f32 %v727_v44 }
 0x420   : > { %v1431_v45 = vpop.eup %1430 }
 0x421   : > { %v562_v46 = vsel %vm312_vm1, %v1431_v45, 0.0  ;;  %v1433_v47 = vpop.eup %1432 }
 0x422   : > { %563 = vadd.xlane.f32.xlu1 %v562_v46  ;;  %v896_v49 = vsel %vm312_vm1, %v1433_v47, 0.0 }
 0x424   : > { %v1435_v48 = vpop.eup %1434 }
 0x425   : > { %v729_v50 = vsel %vm312_vm1, %v1435_v48, 0.0 }
 0x426   : > { %897 = vadd.xlane.f32.xlu1 %v896_v49  ;;  %730 = vadd.xlane.f32.xlu0 %v729_v50 }
 0x4af   : > { %v564_v52 = vpop.xlane.xlu1 %563 }
 0x4b0   : > { %1436 = vrcp.f32 %v564_v52 }
 0x4b3   : > { %v731_v53 = vpop.xlane.xlu0 %730  ;;  %v898_v54 = vpop.xlane.xlu1 %897 }
 0x4b4   : > { %1438 = vrcp.f32 %v731_v53 }
 0x4b5   : > { %1440 = vrcp.f32 %v898_v54 }
 0x4ba   : > { %v1437_v55 = vpop.eup %1436 }
 0x4bb   : > { %v566_v56 = vmul.f32 %v1437_v55, %v1431_v45 }
 0x4bd   : > { %1310 = vmatmul.mubr.msk.f32.vlgmr.msra.gmra.mrb[6].mxu0 %vm312_vm1, %v566_v56 }
 0x4be   : > { %v1439_v58 = vpop.eup %1438  ;;  %1318 = vmatpush3.msra.mxu0 %v1249_v57  ;;  %1319 = vmatprep.mubr.msk.f32.mxu0 %vm1643_vm0, %v1642_v0 }
 0x4bf   : > { %v733_v59 = vmul.f32 %v1439_v58, %v1435_v48  ;;  %1327 = vmatprep.subr.mxu0 %v1642_v0  ;;  %v1441_v61 = vpop.eup %1440 }
 0x4c0   : > { %v900_v62 = vmul.f32 %v1441_v61, %v1433_v47 }
 0x4c1   : > { %1320 = vmatmul.mubr.msk.f32.vlgmr.msra.gmra.mrb[8].mxu0 %vm312_vm1, %v733_v59 }
 0x4c2   : > { %1328 = vmatpush3.msra.mxu0 %v1255_v60  ;;  %1329 = vmatprep.mubr.msk.f32.mxu0 %vm1643_vm0, %v1642_v0 }
 0x4c5   : > { %1330 = vmatmul.mubr.msk.f32.vlgmr.msra.gmra.mrb[10].mxu0 %vm312_vm1, %v900_v62 }
 0x590   : > { %v636_v7 = vpop.f32.mrb[6].mxu0 }
 0x591   : > { %975 = vrot.lane.b32.xlu0 %v636_v7, %s1645_s11  ;;  %v1311_v0 = vpop.f32.mrb[7].mxu0 }
 0x594   : > { %v803_v8 = vpop.f32.mrb[8].mxu0 }
 0x595   : > { %979 = vrot.lane.b32.xlu1 %v803_v8, %s1646_s1  ;;  %v1321_v9 = vpop.f32.mrb[9].mxu0 }
 0x598   : > { %v970_v10 = vpop.f32.mrb[10].mxu0 }
 0x599   : > { %983 = vrot.lane.b32.xlu1 %v970_v10, %s1647_s5  ;;  %v1331_v11 = vpop.f32.mrb[11].mxu0 }
 0x603   : > { %v976_v12 = vpop.permute.xlu0 %975 }
 0x604   : > { %v986_v14 = vsel %vm312_vm1, %v1970_v30, %v976_v12 }
 0x607   : > { %v980_v13 = vpop.permute.xlu1 %979 }
 0x608   : > { %v988_v15 = vsel %vm987_vm4, %v986_v14, %v980_v13 }
 0x60b   : > { %v984_v16 = vpop.permute.xlu1 %983 }
 0x60c   : > { %v990_v17 = vsel %vm989_vm5, %v988_v15, %v984_v16 }
 0x60d   : > { %1341 = vmatmul.mubr.msk.f32.vlgmr.msra.gmra.mrb[4].mxu1 %vm995_vm2, %v990_v17 }
 0x6e0   : > { %v1077_v18 = vpop.f32.mrb[4].mxu1 }
 0x6e1   : > { %1081 = vst.msk [vmem:[%s307_s6] sm:$0xff] %vm995_vm2, %v1077_v18  ;;  %v1342_v19 = vpop.f32.mrb[5].mxu1 }
 0x6e2   : > { %1573 = shalt.err (!%p1570_p4)
}
 0x6e3   : > { %s1574_s23 = scalar_lea.hbm %s1999_s13, 128  ;;  %s1578_s22 = scalar_lea.hbm %s2048_s4, 256 }
 0x6e4   : > { %p1575_p7 = scmp.ne.s32.totalorder %s1999_s13, %s1574_s23  ;;  %p1579_p11 = scmp.lt.u32.totalorder %s1999_s13, %s2048_s4 }
 0x6e5   : > { %p1580_p0 = scmp.lt.u32.totalorder %s1578_s22, %s1574_s23  ;;  %p1582_p2 = scmp.lt.u32.totalorder %s1574_s23, %s1999_s13 }
 0x6e6   : > { %p1576_p5 = pnand %p1575_p7, %p2093_p12 }
 0x6e7   : > { %p1581_p1 = por %p1580_p0, %p1579_p11 }
 0x6e8   : > { %p1577_p8 = pneg %p1576_p5 }
 0x6e9   : > { %p1583_p10 = por %p1582_p2, %p1581_p1 }
 0x6eb   : > { %p1584_p13 = pnand %p1583_p10, %p1577_p8 }
 0x6ed   : > { %1587 = shalt.err (!%p1584_p13)
}
 0x6ee   : > { %1361 = dma.vmem_to_hbm [thread:$0]  (%p2093_p12), %s2001_s27, 128, %s1999_s13, %s1083_s28  }
 0x6ef PF: > { %s2094_s0 = sld [smem:[#allocation19_spill]]  ;;  %s2095_s26 = sld [smem:[#allocation16_spill]] }
 0x6f0   : > { %s1108_s7 = sand.u32 1, %s1622_s15  }
 0x6f1   : > { %s1109_s12 = scalar_lea.sflag [#allocation4], %s1108_s7 }
 0x6f5   : > { %p2096_p3 = scmp.ne.s32.totalorder %s2094_s0, 0  ;;  %p2097_p9 = scmp.ge.s32.totalorder %s2095_s26, 2 }
 0x6f7   : > { %p1378_p6 = pnand %p2097_p9, %p2096_p3 }
 0x6f9   : > { %1617 = dma.done.wait (!%p1378_p6), %s1109_s12, 128  }
 0x6fa   : > { %1619 = vsyncadd (!%p1378_p6), %s1109_s12, 4294967168  ;;  %s2098_s18 = sld [smem:[#allocation17_spill]]  ;;  %s2099_s11 = sld [smem:[#allocation15_spill]] }
 0x6fb   : > { %s2100_s17 = sld [smem:[#allocation18_spill]]  ;;  %s2101_s15 = smov %s1626_s16 }
 0x700   : > { %p21_p4 = scmp.ge.s32.totalorder %s2098_s18, 4   ;;  %s2102_s16 = smov %s2099_s11 }
 0x702   :  { %23 = sbr.rel (!%p21_p4) target bundleno = 11 (0xb), region = 118 }
 0x709   :  { %1114 = vsyncpa [#allocation3], 1 }
 0x70a   :  { %1116 = vsyncpa [#allocation3 + $0x1], 1 }
 0x70b   :  { %1117 = vsyncpa [#allocation6], 1 }
 0x70c   :  { %1119 = vsyncpa [#allocation6 + $0x1], 1 }
 0x70d   :  { %1120 = vsyncpa [#allocation9], 1 }
 0x70e   :  { %1121 = vsyncpa [#allocation4], 1 }
 0x70f   :  { %1123 = vsyncpa [#allocation4 + $0x1], 1 }

</bundles_post_ra>
